<compile_context>
chip_gen: v7x
topology: tpu7x:2x2x1
jax: 0.10.0
libtpu: 0.0.40
codegen_flags: <defaults>
</compile_context>

<pallas_src>
import jax
import jax.numpy as jnp
from jax.experimental import pallas as pl
from jax.experimental.pallas import tpu as pltpu

_LANE_CANDIDATES = (512, 256, 128)   # lane-dense widths (multiples of 128 -> unmasked vst)
_MAX_TILE_BYTES = 4 * 1024 * 1024    # 4 MiB tiles amortize ~0.35us/step overhead
_SMALL_BYTES = 4 * 1024 * 1024       # single-block path for small, non-128-divisible arrays
# Resident VMEM for the pipeline: 2 (double-buffer) x 2 (in+out) x 4 MiB = 16 MiB.
# 32 MiB scoped limit is safe on v5e/v6e (128 MiB physical) and v7x (64 MiB physical).
_VMEM_LIMIT_BYTES = 32 * 1024 * 1024


def _copy_kernel(x_ref, o_ref):
    # Pure copy: output tile = input tile.
    o_ref[...] = x_ref[...]


def _sublane_multiple(dtype) -> int:
    # f32: 8, bf16/f16: 16, int8/fp8: 32. Other itemsizes fall back to 8
    # (no f64 on TPU; harmless default).
    return {4: 8, 2: 16, 1: 32}.get(jnp.dtype(dtype).itemsize, 8)


def _round_up(a: int, b: int) -> int:
    return -(-a // b) * b


def _tiled_copy(x2: jax.Array, tile_rows: int, lanes: int, grid_len: int) -> jax.Array:
    """Lane-dense, row-tiled, double-buffered HBM copy via auto-pipelining."""
    rows = x2.shape[0]
    return pl.pallas_call(
        _copy_kernel,
        out_shape=jax.ShapeDtypeStruct((rows, lanes), x2.dtype),
        grid_spec=pltpu.PrefetchScalarGridSpec(
            num_scalar_prefetch=0,
            grid=(grid_len,),
            in_specs=[pl.BlockSpec((tile_rows, lanes), lambda i: (i, 0))],
            out_specs=pl.BlockSpec((tile_rows, lanes), lambda i: (i, 0)),
        ),
        compiler_params=pltpu.CompilerParams(
            dimension_semantics=("parallel",),      # megacore sharding on v7x
            vmem_limit_bytes=_VMEM_LIMIT_BYTES,
        ),
        # Output aliases the input HBM buffer. Safe only because the kernel
        # writes back identical bytes (pure identity copy).
        input_output_aliases={0: 0},
    )(x2)


def _identity_pallas(x: jax.Array) -> jax.Array:
    """Identity expressed as a Pallas copy kernel (explicit kernel boundary)."""
    orig_shape = x.shape
    dtype = x.dtype
    n = int(x.size)
    if n == 0:
        return x

    itemsize = jnp.dtype(dtype).itemsize
    sub = _sublane_multiple(dtype)

    # ---- Preferred path: zero-copy reshape to a lane-dense (rows, lanes) slab.
    lanes = next((l for l in _LANE_CANDIDATES if n % l == 0), None)
    if lanes is not None:
        rows = n // lanes
        x2 = x.reshape(rows, lanes)        # contiguous reshape: no HBM traffic
        if rows <= sub:
            # Block equals the full row extent (no (8,128) alignment needed).
            tile_rows = rows
        else:
            # Biggest tile under the 4 MiB budget, but keep >= 2 grid steps so
            # both v7x TensorCores get work; always a multiple of the sublane
            # packing factor.
            budget_rows = max(sub, (_MAX_TILE_BYTES // (lanes * itemsize)) // sub * sub)
            half_rows = _round_up(_round_up(rows, 2) // 2, sub)
            tile_rows = max(sub, min(budget_rows, half_rows))
        grid_len = pl.cdiv(rows, tile_rows)   # partial last block handled by Pallas
        out2 = _tiled_copy(x2, tile_rows, lanes, grid_len)
        return out2.reshape(orig_shape)

    # ---- Small arrays not divisible by 128: single full-array block, no padding.
    if n * itemsize <= _SMALL_BYTES:
        x2 = x.reshape(1, n)               # zero-copy; block == full dims is allowed
        out = pl.pallas_call(
            _copy_kernel,
            out_shape=jax.ShapeDtypeStruct((1, n), dtype),
            input_output_aliases={0: 0},
        )(x2)
        return out.reshape(orig_shape)

    # ---- Rare fallback: large AND not divisible by 128. Pad the flat array up
    #      to the next lane multiple (<128 extra elements), copy, slice back.
    #      This is the only path that pays extra HBM traffic for pad/slice.
    lanes = 128
    rows = -(-n // lanes)
    n_pad = rows * lanes
    flat = jnp.pad(x.reshape(-1), (0, n_pad - n))
    x2 = flat.reshape(rows, lanes)
    budget_rows = max(sub, (_MAX_TILE_BYTES // (lanes * itemsize)) // sub * sub)
    tile_rows = min(budget_rows, _round_up(rows, sub))
    grid_len = pl.cdiv(rows, tile_rows)
    out2 = _tiled_copy(x2, tile_rows, lanes, grid_len)
    return out2.reshape(-1)[:n].reshape(orig_shape)


def identity(x: jax.Array, *, force_kernel: bool = False) -> jax.Array:
    """Forward pass of the Identity module.

    Fast path returns `x` unchanged (no HBM traffic, no kernel launch), which
    is the optimal implementation. Set `force_kernel=True` only if an explicit
    kernel boundary is required for composability/testing; that path performs
    a lane-dense, tiled HBM copy with an aliased output buffer.
    """
    if not force_kernel:
        return x
    return _identity_pallas(x)


if __name__ == "__main__":
    key = jax.random.PRNGKey(0)
    # Small NCHW-like input consistent with a generic forward(x).
    x = jax.random.normal(key, (2, 4, 16, 16), dtype=jnp.float32)

    # 1) Optimal path: pure passthrough (no data movement at all).
    y_fast = identity(x)
    jax.block_until_ready(y_fast)
    assert y_fast.shape == x.shape and y_fast.dtype == x.dtype
    assert bool(jnp.all(y_fast == x)), "fast-path identity differs from input"

    # 2) Kernel path on the module's shape (2048 elems = 4 x 512: zero-pad-free,
    #    single lane-dense block).
    y_kernel = identity(x, force_kernel=True)
    jax.block_until_ready(y_kernel)
    assert y_kernel.shape == x.shape, f"shape mismatch: {y_kernel.shape} vs {x.shape}"
    assert y_kernel.dtype == x.dtype, f"dtype mismatch: {y_kernel.dtype} vs {x.dtype}"
    assert bool(jnp.all(y_kernel == x)), "kernel identity output differs from input"

    # 3) Exercise the multi-step pipelined path (rows > sublane multiple,
    #    grid >= 2 so the v7x megacore split is covered).
    x_big = jax.random.normal(jax.random.PRNGKey(1), (64, 512), dtype=jnp.float32)
    y_big = identity(x_big, force_kernel=True)
    jax.block_until_ready(y_big)
    assert bool(jnp.all(y_big == x_big)), "tiled kernel identity differs from input"

    # 4) Exercise the pad-free single-block path for a size not divisible by 128.
    x_odd = jax.random.normal(jax.random.PRNGKey(2), (3, 5, 7), dtype=jnp.float32)
    y_odd = identity(x_odd, force_kernel=True)
    jax.block_until_ready(y_odd)
    assert y_odd.shape == x_odd.shape and bool(jnp.all(y_odd == x_odd)), \
        "single-block kernel identity differs from input"

    print("KERNEL_OK")
</pallas_src>

<mosaic_0001>
module attributes {stable_mosaic.version = 11 : i64} {
  func.func @_copy_kernel(%arg0: i32, %arg1: memref<4x512xf32, #tpu.memory_space<vmem>>, %arg2: memref<4x512xf32, #tpu.memory_space<vmem>>) attributes {dimension_semantics = [#tpu.dimension_semantics<parallel>], iteration_bounds = array<i64: 1>, scalar_prefetch = 0 : i64, scratch_operands = 0 : i64, tpu.core_type = #tpu.core_type<tc>, window_params = [{transform_indices = @transform_0, window_bounds = array<i64: 4, 512>}, {transform_indices = @transform_1, window_bounds = array<i64: 4, 512>}]} {
    %c0 = arith.constant 0 : index
    %c0_0 = arith.constant 0 : index
    %0 = vector.load %arg1[%c0, %c0_0] : memref<4x512xf32, #tpu.memory_space<vmem>>, vector<4x512xf32>
    %c0_1 = arith.constant 0 : index
    %c0_2 = arith.constant 0 : index
    %1 = vector.load %arg2[%c0_1, %c0_2] : memref<4x512xf32, #tpu.memory_space<vmem>>, vector<4x512xf32>
    tpu.vector_store %arg2[%c0_1, %c0_2], %0 {strides = array<i32>} : memref<4x512xf32, #tpu.memory_space<vmem>>, vector<4x512xf32>,
    return
  }
  func.func @transform_0(%arg0: i32) -> (i32, i32) {
    %c0_i32 = arith.constant 0 : i32
    %c0_i32_0 = arith.constant 0 : i32
    return %arg0, %c0_i32 : i32, i32
  }
  func.func @transform_1(%arg0: i32) -> (i32, i32) {
    %c0_i32 = arith.constant 0 : i32
    %c0_i32_0 = arith.constant 0 : i32
    return %arg0, %c0_i32 : i32, i32
  }
}

</mosaic_0001>

<bundles_post_ra>
// kernel: tpu_custom_call.1
= control target key start
LH: loop header
LB: loop body
LE: loop exit
PB: predicated region body
PF: predicated region fallthrough
CT: control target
= control target key end

     0   :  { %6 = vsyncpa [#allocation3], 0  ;;  %s126_s0 = inlined_call_operand.hbm [shape: f32[4,512], index: 0, kind: input, shape index: {}, may-alias: {0,1}]   ;;  %s127_s1 = inlined_call_operand.hbm [shape: f32[4,512], index: 1, kind: output, shape index: {}, may-alias: {0,1}]  }
   0x1   :  { %7 = vsyncpa [#allocation4], 0  ;;  %s90_s6 = smov [#allocation2]   ;;  %s42_s10 = scalar_lea.hbm %s126_s0, 256 }
   0x2   :  { %s14_s7 = sshll.u32 %s90_s6, 4  ;;  %p43_p0 = scmp.ne.s32.totalorder %s126_s0, %s42_s10  ;;  %s15_s7 = int_to_ptr.vmem [resolvable:$true] %s14_s7 }
   0x3   :  { %p46_p1 = scmp.lt.u32.totalorder %s42_s10, %s126_s0 }
   0x5   :  { %p48_p2 = pnand %p46_p1, %p43_p0 }
   0x7   :  { %51 = shalt.err (!%p48_p2)
}
   0x8   :  { %s52_s15 = scalar_lea.vmem %s15_s7, 256  ;;  %p57_p4 = scmp.lt.s32.totalorder %s15_s7, %s15_s7 }
   0x9   :  { %p53_p3 = scmp.ne.s32.totalorder %s15_s7, %s52_s15  ;;  %p58_p5 = scmp.lt.s32.totalorder %s52_s15, %s52_s15 }
   0xb   :  { %p59_p6 = por %p58_p5, %p57_p4 }
   0xd   :  { %p60_p7 = pnand %p59_p6, %p53_p3 }
   0xf   :  { %63 = shalt.err (!%p60_p7)
}
  0x10   :  { %17 = dma.hbm_to_vmem [thread:$0]  %s126_s0, 256, %s15_s7, [#allocation3]  }
  0x11   :  { %86 = dma.done.wait [#allocation3], 256  }
  0x12   :  { %87 = vsyncadd [#allocation3], 4294967040  ;;  %s91_s18 = smov [#allocation5]   ;;  %v21_v0 = vld [vmem:[#allocation2] sm:$0xff]  ;;  %v22_v1 = vld [vmem:[#allocation2 + $0x8] sm:$0xff] }
  0x13   :  { %s31_s19 = sshll.u32 %s91_s18, 4  ;;  %23 = vst [vmem:[#allocation5] sm:$0xff] %v21_v0  ;;  %24 = vst [vmem:[#allocation5 + $0x8] sm:$0xff] %v22_v1  ;;  %s32_s19 = int_to_ptr.vmem [resolvable:$true] %s31_s19 }
  0x14   :  { %s64_s20 = scalar_lea.vmem %s32_s19, 256  ;;  %p69_p9 = scmp.lt.s32.totalorder %s32_s19, %s32_s19 }
  0x15   :  { %p65_p8 = scmp.ne.s32.totalorder %s32_s19, %s64_s20  ;;  %p70_p10 = scmp.lt.s32.totalorder %s64_s20, %s64_s20 }
  0x17   :  { %p71_p11 = por %p70_p10, %p69_p9 }
  0x19   :  { %p72_p12 = pnand %p71_p11, %p65_p8 }
  0x1b   :  { %75 = shalt.err (!%p72_p12)
}
  0x1c   :  { %s76_s0 = scalar_lea.hbm %s127_s1, 256 }
  0x1d   :  { %p77_p13 = scmp.ne.s32.totalorder %s127_s1, %s76_s0  ;;  %p80_p0 = scmp.lt.u32.totalorder %s76_s0, %s127_s1 }
  0x1f   :  { %p82_p1 = pnand %p80_p0, %p77_p13 }
  0x21   :  { %85 = shalt.err (!%p82_p1)
}
  0x22   :  { %34 = dma.vmem_to_hbm [thread:$0]  %s32_s19, 256, %s127_s1, [#allocation4]  }
  0x23   :  { %88 = dma.done.wait [#allocation4], 256  }
  0x24   :  { %89 = vsyncadd [#allocation4], 4294967040 }
  0x25   :  { %38 = vsyncpa [#allocation3], 1 }
  0x26   :  { %39 = vsyncpa [#allocation4], 1 }

</bundles_post_ra>
